<compile_context>
chip_gen: v5e
topology: v5e:2x2
jax: 0.10.0
libtpu: 0.0.40
codegen_flags: <defaults>
</compile_context>

<pallas_src>
import functools

import jax
import jax.numpy as jnp
import numpy as np
from jax.experimental import pallas as pl
from jax.experimental.pallas import tpu as pltpu


def _round_up(x, m):
    return ((x + m - 1) // m) * m


def _tta_conv3x3_kernel(x_ref, w_ref, b_ref, o_ref, *, tile, width_pad, guard,
                        n_branch, cout, inv_batch, merge_mode, temperature):
    """One (image, tile) grid step.

    x_ref : (1, 1, Cin, clen)          halo'd window of the guarded flat padded image
    w_ref : (n_branch, 9, Cout, Cin)   per-tap weights (branch 1 = W-mirrored kernel)
    b_ref : (Cout, 1)                  bias (pre-scaled for 'mean')
    o_ref : (1, Cout, tile)            lane-dense output tile (flattened padded grid)
    """
    merged = None
    for br in range(n_branch):
        acc = jnp.zeros((cout, tile), jnp.float32)
        for dh in range(3):
            for dw in range(3):
                # Static lane offset of this tap inside the halo'd window.
                off = guard + (dh - 1) * width_pad + (dw - 1)
                slab = x_ref[0, 0, :, pl.ds(off, tile)]          # (Cin, tile)
                acc = acc + jnp.dot(
                    w_ref[br, dh * 3 + dw].astype(jnp.float32),
                    slab.astype(jnp.float32),
                    preferred_element_type=jnp.float32)
        pred = acc + b_ref[...].astype(jnp.float32)              # (Cout, tile)

        if merge_mode == "mean":
            branch_out = pred                # 1/B and both branches folded into w/b
        else:  # tsharpen: clamp negatives, pow(pred, T)
            p = jnp.maximum(pred, 0.0)
            if temperature == 0.5:
                branch_out = jnp.sqrt(p)     # 1 EUP op instead of exp+log
            else:
                safe = jnp.where(p > 0.0, p, 1.0)                # keep log() NaN-free
                branch_out = jnp.where(p > 0.0,
                                       jnp.exp(temperature * jnp.log(safe)), 0.0)

        merged = branch_out if merged is None else merged + branch_out

    if merge_mode == "tsharpen":
        merged = merged * inv_batch          # PyTorch divides by batch size, not #augs

    o_ref[...] = merged[None].astype(o_ref.dtype)


def _pick_vmem_limit():
    try:
        info = pltpu.get_tpu_info()
        cap = getattr(info, "vmem_capacity_bytes", None)
        if cap:
            return min(int(cap * 0.6), 64 * 1024 * 1024)
    except Exception:
        pass
    return 32 * 1024 * 1024


def tta_forward(x_nchw, conv_w, conv_b, merge_mode="mean", temperature=0.5,
                tile=None, max_tile=1024):
    """Pallas implementation of TTAWrapper(Conv2d(Cin, Cout, 3, padding=1)).forward."""
    if merge_mode not in ("mean", "tsharpen"):
        raise ValueError("Merge type is not correct: `{}`.".format(merge_mode))

    B, Cin, H, W = x_nchw.shape
    Cout = conv_w.shape[0]
    Hp, Wp = H + 2, W + 2
    P = Hp * Wp                      # flattened padded grid
    G = Wp + 1                       # max |flat shift| of a 3x3 tap == W + 3

    if tile is None:
        tile = min(max_tile, _round_up(P, 128))
    assert tile % 128 == 0, "tile must be a multiple of 128 (lane-dense output)"
    n_tiles = -(-P // tile)
    P_out = n_tiles * tile
    clen = _round_up(tile + 2 * G, 128)          # halo'd window length per tile
    L = (n_tiles - 1) * tile + clen              # guarded flat length

    # ---- glue (cheap, ~1.1x input bytes): pad(1), flatten spatial, guard band, tiles
    x_pad = jnp.pad(x_nchw, ((0, 0), (0, 0), (1, 1), (1, 1)))   # (B, Cin, H+2, W+2)
    x_flat = x_pad.reshape(B, Cin, P)
    x_g = jnp.pad(x_flat, ((0, 0), (0, 0), (G, L - G - P)))     # (B, Cin, L)
    x_tiles = jnp.stack([x_g[:, :, t * tile: t * tile + clen]
                         for t in range(n_tiles)], axis=1)      # (B, n_tiles, Cin, clen)

    # ---- per-tap weights, channel-major: (n_branch, 9, Cout, Cin) ----
    w_orig = jnp.transpose(conv_w, (2, 3, 0, 1)).reshape(9, Cout, Cin)
    w_mirr = jnp.transpose(conv_w[:, :, :, ::-1], (2, 3, 0, 1)).reshape(9, Cout, Cin)
    if merge_mode == "mean":
        # conv(x,w) + flipW(conv(flipW(x),w)) == conv(x, w + mirror_W(w)); fold 1/B too.
        w_fold = ((w_orig + w_mirr) * (1.0 / B))[None]          # (1, 9, Cout, Cin)
        b_fold = (2.0 * conv_b / B).reshape(Cout, 1)
        n_branch = 1
    else:
        w_fold = jnp.stack([w_orig, w_mirr])                    # (2, 9, Cout, Cin)
        b_fold = conv_b.reshape(Cout, 1)
        n_branch = 2

    kernel = functools.partial(
        _tta_conv3x3_kernel, tile=tile, width_pad=Wp, guard=G,
        n_branch=n_branch, cout=Cout, inv_batch=1.0 / B,
        merge_mode=merge_mode, temperature=temperature)

    out_flat = pl.pallas_call(
        kernel,
        out_shape=jax.ShapeDtypeStruct((B, Cout, P_out), x_nchw.dtype),
        grid=(B, n_tiles),
        in_specs=[
            pl.BlockSpec((1, 1, Cin, clen), lambda b, t: (b, t, 0, 0)),
            pl.BlockSpec((n_branch, 9, Cout, Cin), lambda b, t: (0, 0, 0, 0)),
            pl.BlockSpec((Cout, 1), lambda b, t: (0, 0)),
        ],
        out_specs=pl.BlockSpec((1, Cout, tile), lambda b, t: (b, 0, t)),
        compiler_params=pltpu.CompilerParams(
            dimension_semantics=("parallel", "parallel"),
            vmem_limit_bytes=_pick_vmem_limit(),
        ),
    )(x_tiles, w_fold, b_fold)

    # Extract the interior of the padded grid; result is already NCHW (no transpose).
    out = out_flat[:, :, :P].reshape(B, Cout, Hp, Wp)[:, :, 1:H + 1, 1:W + 1]
    return out


def tta_reference(x_nchw, conv_w, conv_b, merge_mode="mean", temperature=0.5):
    """Literal (pure-JAX) transcription of the PyTorch forward, for checking."""
    B = x_nchw.shape[0]

    def model(imgs):  # NCHW conv, padding=1, + bias
        y = jax.lax.conv_general_dilated(
            imgs, conv_w, window_strides=(1, 1), padding=((1, 1), (1, 1)),
            dimension_numbers=("NCHW", "OIHW", "NCHW"))
        return y + conv_b[None, :, None, None]

    outs = []
    for i in range(B):
        img = x_nchw[i]                                 # [C, H, W]
        augmented = jnp.stack([img, img[:, :, ::-1]])   # transform: [orig, flip(dim 2)]
        pred = model(augmented)                         # [2, Cout, H, W]
        pred = pred.at[1].set(pred[1][:, :, ::-1])      # inv_transform
        if merge_mode == "mean":
            merged = pred.sum(0)
        else:
            pred = jnp.maximum(pred, 0.0)
            merged = (jnp.power(pred[0], temperature)
                      + jnp.power(pred[1], temperature))
        outs.append((merged / B)[None])
    return jnp.concatenate(outs, axis=0)


if __name__ == "__main__":
    key = jax.random.PRNGKey(0)
    k_x, k_w, k_b = jax.random.split(key, 3)

    B, Cin, H, W, Cout = 2, 4, 16, 16, 4
    x = jax.random.normal(k_x, (B, Cin, H, W), dtype=jnp.float32)
    conv_w = 0.1 * jax.random.normal(k_w, (Cout, Cin, 3, 3), dtype=jnp.float32)
    conv_b = 0.1 * jax.random.normal(k_b, (Cout,), dtype=jnp.float32)

    configs = [("mean", 0.5), ("tsharpen", 0.5), ("tsharpen", 0.75)]
    for mode, temp in configs:
        ref = jax.block_until_ready(
            tta_reference(x, conv_w, conv_b, merge_mode=mode, temperature=temp))
        for tl in (None, 128):   # single-tile grid and a 3-step tiled grid
            out = jax.block_until_ready(
                tta_forward(x, conv_w, conv_b, merge_mode=mode,
                            temperature=temp, tile=tl))
            np.testing.assert_allclose(np.asarray(out), np.asarray(ref),
                                       rtol=1e-4, atol=1e-4)

    print("KERNEL_OK")
</pallas_src>

<mosaic_0001>
module attributes {stable_mosaic.version = 11 : i64} {
  func.func @_tta_conv3x3_kernel(%arg0: i32, %arg1: i32, %arg2: memref<1x1x4x512xf32, #tpu.memory_space<vmem>>, %arg3: memref<1x9x4x4xf32, #tpu.memory_space<vmem>>, %arg4: memref<4x1xf32, #tpu.memory_space<vmem>>, %arg5: memref<1x4x384xf32, #tpu.memory_space<vmem>>) attributes {dimension_semantics = [#tpu.dimension_semantics<parallel>, #tpu.dimension_semantics<parallel>], iteration_bounds = array<i64: 2, 1>, scalar_prefetch = 0 : i64, scratch_operands = 0 : i64, tpu.core_type = #tpu.core_type<tc>, window_params = [{transform_indices = @transform_0, window_bounds = array<i64: 1, 1, 4, 512>}, {pipeline_mode = #tpu.pipeline_mode<synchronous>, transform_indices = @transform_1, window_bounds = array<i64: 1, 9, 4, 4>}, {pipeline_mode = #tpu.pipeline_mode<synchronous>, transform_indices = @transform_2, window_bounds = array<i64: 4, 1>}, {transform_indices = @transform_3, window_bounds = array<i64: 1, 4, 384>}]} {
    %cst = arith.constant 0.000000e+00 : f32
    %0 = vector.broadcast %cst : f32 to vector<4x384xf32>
    %c0 = arith.constant 0 : index
    %c0_0 = arith.constant 0 : index
    %c0_1 = arith.constant 0 : index
    %c0_2 = arith.constant 0 : index
    %1 = vector.load %arg2[%c0, %c0_0, %c0_1, %c0_2] : memref<1x1x4x512xf32, #tpu.memory_space<vmem>>, vector<1x1x4x384xf32>
    %2 = vector.shape_cast %1 : vector<1x1x4x384xf32> to vector<4x384xf32>
    %c0_3 = arith.constant 0 : index
    %c0_4 = arith.constant 0 : index
    %c0_5 = arith.constant 0 : index
    %c0_6 = arith.constant 0 : index
    %3 = vector.load %arg3[%c0_3, %c0_4, %c0_5, %c0_6] : memref<1x9x4x4xf32, #tpu.memory_space<vmem>>, vector<1x1x4x4xf32>
    %4 = vector.shape_cast %3 : vector<1x1x4x4xf32> to vector<4x4xf32>
    %cst_7 = arith.constant dense<0.000000e+00> : vector<4x384xf32>
    %5 = tpu.matmul %4, %2, %cst_7 {dimension_numbers = #tpu.dot_dimension_numbers<[1], [0], [0], [1], [0, 0, 1, 1], [], []>} : vector<4x4xf32>, vector<4x384xf32>, vector<4x384xf32> -> vector<4x384xf32>
    %6 = arith.addf %0, %5 : vector<4x384xf32>
    %c0_8 = arith.constant 0 : index
    %c0_9 = arith.constant 0 : index
    %c0_10 = arith.constant 0 : index
    %c1 = arith.constant 1 : index
    %7 = vector.load %arg2[%c0_8, %c0_9, %c0_10, %c1] : memref<1x1x4x512xf32, #tpu.memory_space<vmem>>, vector<1x1x4x384xf32>
    %8 = vector.shape_cast %7 : vector<1x1x4x384xf32> to vector<4x384xf32>
    %c0_11 = arith.constant 0 : index
    %c1_12 = arith.constant 1 : index
    %c0_13 = arith.constant 0 : index
    %c0_14 = arith.constant 0 : index
    %9 = vector.load %arg3[%c0_11, %c1_12, %c0_13, %c0_14] : memref<1x9x4x4xf32, #tpu.memory_space<vmem>>, vector<1x1x4x4xf32>
    %10 = vector.shape_cast %9 : vector<1x1x4x4xf32> to vector<4x4xf32>
    %cst_15 = arith.constant dense<0.000000e+00> : vector<4x384xf32>
    %11 = tpu.matmul %10, %8, %cst_15 {dimension_numbers = #tpu.dot_dimension_numbers<[1], [0], [0], [1], [0, 0, 1, 1], [], []>} : vector<4x4xf32>, vector<4x384xf32>, vector<4x384xf32> -> vector<4x384xf32>
    %12 = arith.addf %6, %11 : vector<4x384xf32>
    %c0_16 = arith.constant 0 : index
    %c0_17 = arith.constant 0 : index
    %c0_18 = arith.constant 0 : index
    %c2 = arith.constant 2 : index
    %13 = vector.load %arg2[%c0_16, %c0_17, %c0_18, %c2] : memref<1x1x4x512xf32, #tpu.memory_space<vmem>>, vector<1x1x4x384xf32>
    %14 = vector.shape_cast %13 : vector<1x1x4x384xf32> to vector<4x384xf32>
    %c0_19 = arith.constant 0 : index
    %c2_20 = arith.constant 2 : index
    %c0_21 = arith.constant 0 : index
    %c0_22 = arith.constant 0 : index
    %15 = vector.load %arg3[%c0_19, %c2_20, %c0_21, %c0_22] : memref<1x9x4x4xf32, #tpu.memory_space<vmem>>, vector<1x1x4x4xf32>
    %16 = vector.shape_cast %15 : vector<1x1x4x4xf32> to vector<4x4xf32>
    %cst_23 = arith.constant dense<0.000000e+00> : vector<4x384xf32>
    %17 = tpu.matmul %16, %14, %cst_23 {dimension_numbers = #tpu.dot_dimension_numbers<[1], [0], [0], [1], [0, 0, 1, 1], [], []>} : vector<4x4xf32>, vector<4x384xf32>, vector<4x384xf32> -> vector<4x384xf32>
    %18 = arith.addf %12, %17 : vector<4x384xf32>
    %c0_24 = arith.constant 0 : index
    %c0_25 = arith.constant 0 : index
    %c0_26 = arith.constant 0 : index
    %c18 = arith.constant 18 : index
    %19 = vector.load %arg2[%c0_24, %c0_25, %c0_26, %c18] : memref<1x1x4x512xf32, #tpu.memory_space<vmem>>, vector<1x1x4x384xf32>
    %20 = vector.shape_cast %19 : vector<1x1x4x384xf32> to vector<4x384xf32>
    %c0_27 = arith.constant 0 : index
    %c3 = arith.constant 3 : index
    %c0_28 = arith.constant 0 : index
    %c0_29 = arith.constant 0 : index
    %21 = vector.load %arg3[%c0_27, %c3, %c0_28, %c0_29] : memref<1x9x4x4xf32, #tpu.memory_space<vmem>>, vector<1x1x4x4xf32>
    %22 = vector.shape_cast %21 : vector<1x1x4x4xf32> to vector<4x4xf32>
    %cst_30 = arith.constant dense<0.000000e+00> : vector<4x384xf32>
    %23 = tpu.matmul %22, %20, %cst_30 {dimension_numbers = #tpu.dot_dimension_numbers<[1], [0], [0], [1], [0, 0, 1, 1], [], []>} : vector<4x4xf32>, vector<4x384xf32>, vector<4x384xf32> -> vector<4x384xf32>
    %24 = arith.addf %18, %23 : vector<4x384xf32>
    %c0_31 = arith.constant 0 : index
    %c0_32 = arith.constant 0 : index
    %c0_33 = arith.constant 0 : index
    %c19 = arith.constant 19 : index
    %25 = vector.load %arg2[%c0_31, %c0_32, %c0_33, %c19] : memref<1x1x4x512xf32, #tpu.memory_space<vmem>>, vector<1x1x4x384xf32>
    %26 = vector.shape_cast %25 : vector<1x1x4x384xf32> to vector<4x384xf32>
    %c0_34 = arith.constant 0 : index
    %c4 = arith.constant 4 : index
    %c0_35 = arith.constant 0 : index
    %c0_36 = arith.constant 0 : index
    %27 = vector.load %arg3[%c0_34, %c4, %c0_35, %c0_36] : memref<1x9x4x4xf32, #tpu.memory_space<vmem>>, vector<1x1x4x4xf32>
    %28 = vector.shape_cast %27 : vector<1x1x4x4xf32> to vector<4x4xf32>
    %cst_37 = arith.constant dense<0.000000e+00> : vector<4x384xf32>
    %29 = tpu.matmul %28, %26, %cst_37 {dimension_numbers = #tpu.dot_dimension_numbers<[1], [0], [0], [1], [0, 0, 1, 1], [], []>} : vector<4x4xf32>, vector<4x384xf32>, vector<4x384xf32> -> vector<4x384xf32>
    %30 = arith.addf %24, %29 : vector<4x384xf32>
    %c0_38 = arith.constant 0 : index
    %c0_39 = arith.constant 0 : index
    %c0_40 = arith.constant 0 : index
    %c20 = arith.constant 20 : index
    %31 = vector.load %arg2[%c0_38, %c0_39, %c0_40, %c20] : memref<1x1x4x512xf32, #tpu.memory_space<vmem>>, vector<1x1x4x384xf32>
    %32 = vector.shape_cast %31 : vector<1x1x4x384xf32> to vector<4x384xf32>
    %c0_41 = arith.constant 0 : index
    %c5 = arith.constant 5 : index
    %c0_42 = arith.constant 0 : index
    %c0_43 = arith.constant 0 : index
    %33 = vector.load %arg3[%c0_41, %c5, %c0_42, %c0_43] : memref<1x9x4x4xf32, #tpu.memory_space<vmem>>, vector<1x1x4x4xf32>
    %34 = vector.shape_cast %33 : vector<1x1x4x4xf32> to vector<4x4xf32>
    %cst_44 = arith.constant dense<0.000000e+00> : vector<4x384xf32>
    %35 = tpu.matmul %34, %32, %cst_44 {dimension_numbers = #tpu.dot_dimension_numbers<[1], [0], [0], [1], [0, 0, 1, 1], [], []>} : vector<4x4xf32>, vector<4x384xf32>, vector<4x384xf32> -> vector<4x384xf32>
    %36 = arith.addf %30, %35 : vector<4x384xf32>
    %c0_45 = arith.constant 0 : index
    %c0_46 = arith.constant 0 : index
    %c0_47 = arith.constant 0 : index
    %c36 = arith.constant 36 : index
    %37 = vector.load %arg2[%c0_45, %c0_46, %c0_47, %c36] : memref<1x1x4x512xf32, #tpu.memory_space<vmem>>, vector<1x1x4x384xf32>
    %38 = vector.shape_cast %37 : vector<1x1x4x384xf32> to vector<4x384xf32>
    %c0_48 = arith.constant 0 : index
    %c6 = arith.constant 6 : index
    %c0_49 = arith.constant 0 : index
    %c0_50 = arith.constant 0 : index
    %39 = vector.load %arg3[%c0_48, %c6, %c0_49, %c0_50] : memref<1x9x4x4xf32, #tpu.memory_space<vmem>>, vector<1x1x4x4xf32>
    %40 = vector.shape_cast %39 : vector<1x1x4x4xf32> to vector<4x4xf32>
    %cst_51 = arith.constant dense<0.000000e+00> : vector<4x384xf32>
    %41 = tpu.matmul %40, %38, %cst_51 {dimension_numbers = #tpu.dot_dimension_numbers<[1], [0], [0], [1], [0, 0, 1, 1], [], []>} : vector<4x4xf32>, vector<4x384xf32>, vector<4x384xf32> -> vector<4x384xf32>
    %42 = arith.addf %36, %41 : vector<4x384xf32>
    %c0_52 = arith.constant 0 : index
    %c0_53 = arith.constant 0 : index
    %c0_54 = arith.constant 0 : index
    %c37 = arith.constant 37 : index
    %43 = vector.load %arg2[%c0_52, %c0_53, %c0_54, %c37] : memref<1x1x4x512xf32, #tpu.memory_space<vmem>>, vector<1x1x4x384xf32>
    %44 = vector.shape_cast %43 : vector<1x1x4x384xf32> to vector<4x384xf32>
    %c0_55 = arith.constant 0 : index
    %c7 = arith.constant 7 : index
    %c0_56 = arith.constant 0 : index
    %c0_57 = arith.constant 0 : index
    %45 = vector.load %arg3[%c0_55, %c7, %c0_56, %c0_57] : memref<1x9x4x4xf32, #tpu.memory_space<vmem>>, vector<1x1x4x4xf32>
    %46 = vector.shape_cast %45 : vector<1x1x4x4xf32> to vector<4x4xf32>
    %cst_58 = arith.constant dense<0.000000e+00> : vector<4x384xf32>
    %47 = tpu.matmul %46, %44, %cst_58 {dimension_numbers = #tpu.dot_dimension_numbers<[1], [0], [0], [1], [0, 0, 1, 1], [], []>} : vector<4x4xf32>, vector<4x384xf32>, vector<4x384xf32> -> vector<4x384xf32>
    %48 = arith.addf %42, %47 : vector<4x384xf32>
    %c0_59 = arith.constant 0 : index
    %c0_60 = arith.constant 0 : index
    %c0_61 = arith.constant 0 : index
    %c38 = arith.constant 38 : index
    %49 = vector.load %arg2[%c0_59, %c0_60, %c0_61, %c38] : memref<1x1x4x512xf32, #tpu.memory_space<vmem>>, vector<1x1x4x384xf32>
    %50 = vector.shape_cast %49 : vector<1x1x4x384xf32> to vector<4x384xf32>
    %c0_62 = arith.constant 0 : index
    %c8 = arith.constant 8 : index
    %c0_63 = arith.constant 0 : index
    %c0_64 = arith.constant 0 : index
    %51 = vector.load %arg3[%c0_62, %c8, %c0_63, %c0_64] : memref<1x9x4x4xf32, #tpu.memory_space<vmem>>, vector<1x1x4x4xf32>
    %52 = vector.shape_cast %51 : vector<1x1x4x4xf32> to vector<4x4xf32>
    %cst_65 = arith.constant dense<0.000000e+00> : vector<4x384xf32>
    %53 = tpu.matmul %52, %50, %cst_65 {dimension_numbers = #tpu.dot_dimension_numbers<[1], [0], [0], [1], [0, 0, 1, 1], [], []>} : vector<4x4xf32>, vector<4x384xf32>, vector<4x384xf32> -> vector<4x384xf32>
    %54 = arith.addf %48, %53 : vector<4x384xf32>
    %c0_66 = arith.constant 0 : index
    %c0_67 = arith.constant 0 : index
    %55 = vector.load %arg4[%c0_66, %c0_67] : memref<4x1xf32, #tpu.memory_space<vmem>>, vector<4x1xf32>
    %56 = vector.broadcast %55 : vector<4x1xf32> to vector<4x384xf32>
    %57 = arith.addf %54, %56 : vector<4x384xf32>
    %58 = vector.shape_cast %57 : vector<4x384xf32> to vector<1x4x384xf32>
    %c0_68 = arith.constant 0 : index
    %c0_69 = arith.constant 0 : index
    %c0_70 = arith.constant 0 : index
    %59 = vector.load %arg5[%c0_68, %c0_69, %c0_70] : memref<1x4x384xf32, #tpu.memory_space<vmem>>, vector<1x4x384xf32>
    tpu.vector_store %arg5[%c0_68, %c0_69, %c0_70], %58 {strides = array<i32>} : memref<1x4x384xf32, #tpu.memory_space<vmem>>, vector<1x4x384xf32>,
    return
  }
  func.func @transform_0(%arg0: i32, %arg1: i32) -> (i32, i32, i32, i32) {
    %c0_i32 = arith.constant 0 : i32
    %c0_i32_0 = arith.constant 0 : i32
    %c0_i32_1 = arith.constant 0 : i32
    return %arg0, %arg1, %c0_i32, %c0_i32_0 : i32, i32, i32, i32
  }
  func.func @transform_1(%arg0: i32, %arg1: i32) -> (i32, i32, i32, i32) {
    %c0_i32 = arith.constant 0 : i32
    %c0_i32_0 = arith.constant 0 : i32
    %c0_i32_1 = arith.constant 0 : i32
    %c0_i32_2 = arith.constant 0 : i32
    %c0_i32_3 = arith.constant 0 : i32
    return %c0_i32, %c0_i32_0, %c0_i32_1, %c0_i32_2 : i32, i32, i32, i32
  }
  func.func @transform_2(%arg0: i32, %arg1: i32) -> (i32, i32) {
    %c0_i32 = arith.constant 0 : i32
    %c0_i32_0 = arith.constant 0 : i32
    %c0_i32_1 = arith.constant 0 : i32
    return %c0_i32, %c0_i32_0 : i32, i32
  }
  func.func @transform_3(%arg0: i32, %arg1: i32) -> (i32, i32, i32) {
    %c0_i32 = arith.constant 0 : i32
    %c0_i32_0 = arith.constant 0 : i32
    return %arg0, %c0_i32, %arg1 : i32, i32, i32
  }
}

</mosaic_0001>

<bundles_post_ra>
// kernel: tpu_custom_call.1
= control target key start
LH: loop header
LB: loop body
LE: loop exit
PB: predicated region body
PF: predicated region fallthrough
CT: control target
= control target key end

     0   :  { %8 = vsyncpa [#allocation3], 0  ;;  %s1635_s0 = inlined_call_operand.vmem [shape: f32[2,1,4,512], index: 0, kind: input, shape index: {}]   ;;  %s1636_s1 = inlined_call_operand.vmem [shape: f32[1,9,4,4], index: 1, kind: input, shape index: {}]   ;;  %s1637_s2 = inlined_call_operand.vmem [shape: f32[4,1], index: 2, kind: input, shape index: {}]   ;;  %s1638_s3 = inlined_call_operand.hbm [shape: f32[2,4,384], index: 3, kind: output, shape index: {}]  }
   0x1   :  { %10 = vsyncpa [#allocation3 + $0x1], 0  ;;  %s1417_s12 = smov 0   ;;  %s1419_s13 = smov 0  }
   0x2   :  { %s1421_s14 = smov 0   ;;  %s1423_s15 = smov 0  }
   0x3   :  { %s1425_s16 = smov 0   ;;  %s1427_s17 = smov 0  }
   0x4 LB: > { %s1167_s18 = sadd.s32 4294967295, %s1386_s17   ;;  %s1168_s19 = sadd.s32 4294967294, %s1386_s17   ;;  %s1386_s17 = sphi %s1427_s17, %s16_s17   ;;  %s1382_s16 = sphi %s1425_s16, %s1645_s16   ;;  %s1378_s15 = sphi %s1423_s15, %s1644_s15   ;;  %s1374_s14 = sphi %s1421_s14, %s1643_s14   ;;  %s1370_s13 = sphi %s1419_s13, %s1642_s13   ;;  %s1366_s12 = sphi %s1417_s12, %s1641_s12  }
   0x5   : > { %s28_s20 = sadd.s32 1, %s1382_s16  ;;  %s107_s21 = sadd.s32 1, %s1374_s14 }
   0x6   : > { %p30_p0 = scmp.ge.s32.totalorder %s28_s20, 2  ;;  %p117_p1 = scmp.ne.s32.totalorder %s1374_s14, %s1370_s13 }
   0x7   : > { %p118_p2 = scmp.eq.s32.totalorder %s1167_s18, 1  ;;  %p123_p3 = scmp.ne.s32.totalorder %s1370_s13, %s1366_s12 }
   0x8   : > { %s1647_s20 = smov (%p30_p0, %s28_s20), 0  ;;  %p124_p5 = scmp.eq.s32.totalorder %s1168_s19, 1 }
   0x9   : > { %p1457_p4 = por %p118_p2, %p117_p1  ;;  %s102_s23 = ssub.s32 %s1382_s16, %s1647_s20 }
   0xa   : > { %p1171_p6 = scmp.ge.s32.totalorder %s1386_s17, 1  ;;  %p105_p7 = scmp.eq.s32.totalorder %s102_s23, 0 }
   0xb   : > { %p1464_p8 = por %p124_p5, %p123_p3  ;;  %p160_p9 = scmp.lt.s32.totalorder %s1386_s17, 3 }
   0xc   : > { %s1470_s25 = scalar_select %p105_p7, %s1374_s14, %s107_s21  }
   0xd   : > { %p161_p10 = pnand %p1171_p6, %p160_p9 }
   0xe   : > { %p188_p11 = scmp.lt.s32.totalorder (!%p161_p10), %s1378_s15, 1  ;;  %s1388_s4 = smov (!%p161_p10), 127  }
   0xf   : > { %164 = sbr.rel (%p161_p10) target bundleno = 368 (0x170), region = 32  ;;  %s1389_s5 = smov (!%p161_p10), 126  }
  0x10   : > { %s1390_s6 = smov (!%p161_p10), 110   ;;  %s1391_s7 = smov (!%p161_p10), 109  }
  0x11   : > { %s1392_s8 = smov (!%p161_p10), 108   ;;  %s1393_s9 = smov (!%p161_p10), 92  }
  0x12   : > { %s1394_s10 = smov (!%p161_p10), 91   ;;  %s1395_s11 = smov (!%p161_p10), 90  }
  0x13   : > { %s185_s23 = sand.u32 (!%p161_p10), 1, %s1370_s13  }
  0x14   : > { %s189_s26 = scalar_select %p188_p11, %s1378_s15, 1  ;;  %vm230_vm0 = vcmask 1043456   ;;  %vm226_vm1 = vcmask 31744   ;;  %v200_v38 = vld [vmem:[%s1636_s1] sm:$0xf]  ;;  %vm222_vm2 = vcmask 1039360  }
  0x15   : > { %v1174_v44 = vld [vmem:[%s1636_s1 + $0x4] sm:$0xf]  ;;  %vm395_vm3 = vcmask 1031168   ;;  %vm492_vm4 = vcmask 900096   ;;  %v1187_v54 = vld [vmem:[%s1636_s1 + $0x8] sm:$0xf] }
  0x16   : > { %s1239_s27 = sshll.u32 %s189_s26, 4  ;;  %v1194_v60 = vld [vmem:[%s1636_s1 + $0xc] sm:$0xf]  ;;  %vm589_vm5 = vcmask 891904   ;;  %vm686_vm6 = vcmask 883712   ;;  %vm783_vm7 = vcmask 752640  }
  0x17   : > { %s196_s30 = scalar_lea.vmem %s1635_s0, %s1239_s27  ;;  %vm880_vm8 = vcmask 744448   ;;  %vm977_vm9 = vcmask 736256   ;;  %s1241_s26 = smul.u32 12, %s1378_s15 }
  0x18   : > { %v1477_v0 = vld [vmem:[%s196_s30 + $0x8] sm:$0xff]  ;;  %v1479_v1 = vld [vmem:[%s196_s30] sm:$0xff]  ;;  %s1240_s27 = smul.u32 12, %s185_s23 }
  0x19   : > { %209 = vst [vmem:[#allocation1 + $0x10] ss:$2 sm:$0xff] %v1477_v0  ;;  %v199_v2 = vld [vmem:[%s196_s30 + $0x8] sm:$0xf]  ;;  %s1083_s30 = scalar_lea.hbm %s1638_s3, %s1241_s26 }
  0x1a   : > { %207 = vst [vmem:[#allocation1] ss:$2 sm:$0xff] %v1479_v1  ;;  %s187_s15 = scalar_lea.vmem [#allocation2], %s1240_s27 }
  0x20   : > { %v212_v3 = vld.sshfl [vmem:[#allocation1 + $0x10] sm:$0xff pattern:$0x75316420]  ;;  %v213_v4 = vld.sshfl [vmem:[#allocation1 + $0x18] sm:$0xff pattern:$0x75316420] }
  0x21   : > { %218 = vrot.lane.b32.xlu0 %v212_v3, %s1388_s4  ;;  %v211_v5 = vld.sshfl [vmem:[#allocation1 + $0x8] sm:$0xff pattern:$0x75316420]  ;;  %301 = vst [vmem:[#allocation1 + $0x10] ss:$2 sm:$0xff] %v199_v2 }
  0x22   : > { %216 = vrot.lane.b32.xlu1 %v211_v5, %s1388_s4  ;;  %v210_v6 = vld.sshfl [vmem:[#allocation1] sm:$0xff pattern:$0x75316420]  ;;  %v1201_v5 = vld [vmem:[%s1636_s1 + $0x10] sm:$0xf] }
  0x23   : > { %299 = vst [vmem:[#allocation1] ss:$2 sm:$0xff] %v1479_v1 }
  0x28   : > { %v1484_v7 = vld.sshfl [vmem:[#allocation1 + $0x10] sm:$0xff pattern:$0x75316420] }
  0x29   : > { %220 = vrot.lane.b32.xlu0 %v213_v4, %s1388_s4  ;;  %382 = vst [vmem:[#allocation1 + $0x10] ss:$2 sm:$0xff] %v1477_v0 }
  0x2a   : > { %214 = vrot.lane.b32.xlu1 %v210_v6, %s1388_s4  ;;  %v1487_v8 = vld.sshfl [vmem:[#allocation1] sm:$0xff pattern:$0x75316420]  ;;  %v1489_v9 = vld.sshfl [vmem:[#allocation1 + $0x8] sm:$0xff pattern:$0x75316420] }
  0x2b   : > { %380 = vst [vmem:[#allocation1] ss:$2 sm:$0xff] %v1479_v1  ;;  %1181 = vmatpush.msk.msra.mxu3 %vm230_vm0, %v1487_v8  ;;  %v1208_v8 = vld [vmem:[%s1636_s1 + $0x14] sm:$0xf]  ;;  %s1085_s4 = sshll.u32 %s187_s15, 4  ;;  %s1086_s4 = int_to_ptr.vmem [resolvable:$true] %s1085_s4 }
  0x2c   : > { %1182 = vmatmul.msk.f32.vlgmr.msra.gmra.mxu3 %vm226_vm1, %v200_v38 }
  0x30   : > { %v386_v10 = vld.sshfl [vmem:[#allocation1 + $0x18] sm:$0xff pattern:$0x75316420]  ;;  %v385_v11 = vld.sshfl [vmem:[#allocation1 + $0x10] sm:$0xff pattern:$0x75316420] }
  0x31   : > { %391 = vrot.lane.b32.xlu0 %v385_v11, %s1389_s5  ;;  %479 = vst [vmem:[#allocation1 + $0x10] ss:$2 sm:$0xff] %v1477_v0 }
  0x32   : > { %393 = vrot.lane.b32.xlu1 %v386_v10, %s1389_s5  ;;  %v383_v12 = vld.sshfl [vmem:[#allocation1] sm:$0xff pattern:$0x75316420]  ;;  %v384_v13 = vld.sshfl [vmem:[#allocation1 + $0x8] sm:$0xff pattern:$0x75316420] }
  0x33   : > { %387 = vrot.lane.b32.xlu2 %v383_v12, %s1389_s5  ;;  %477 = vst [vmem:[#allocation1] ss:$2 sm:$0xff] %v1479_v1 }
  0x38   : > { %v482_v14 = vld.sshfl [vmem:[#allocation1 + $0x10] sm:$0xff pattern:$0x75316420]  ;;  %v483_v15 = vld.sshfl [vmem:[#allocation1 + $0x18] sm:$0xff pattern:$0x75316420] }
  0x39   : > { %576 = vst [vmem:[#allocation1 + $0x10] ss:$2 sm:$0xff] %v1477_v0 }
  0x3a   : > { %v481_v16 = vld.sshfl [vmem:[#allocation1 + $0x8] sm:$0xff pattern:$0x75316420]  ;;  %v480_v17 = vld.sshfl [vmem:[#allocation1] sm:$0xff pattern:$0x75316420] }
  0x3b   : > { %486 = vrot.lane.b32.xlu1 %v481_v16, %s1390_s6  ;;  %484 = vrot.lane.b32.xlu0 %v480_v17, %s1390_s6  ;;  %574 = vst [vmem:[#allocation1] ss:$2 sm:$0xff] %v1479_v1  ;;  %v1053_v16 = vld [vmem:[%s1637_s2] sm:$0xf] }
  0x3c   : > { %389 = vrot.lane.b32.xlu2 %v384_v13, %s1389_s5  ;;  %s1087_s5 = sshll.u32 %s1083_s30, 4  ;;  %s1088_s5 = int_to_ptr.hbm [resolvable:$true] %s1087_s5 }
  0x40   : > { %v580_v18 = vld.sshfl [vmem:[#allocation1 + $0x18] sm:$0xff pattern:$0x75316420]  ;;  %v579_v19 = vld.sshfl [vmem:[#allocation1 + $0x10] sm:$0xff pattern:$0x75316420] }
  0x41   : > { %673 = vst [vmem:[#allocation1 + $0x10] ss:$2 sm:$0xff] %v1477_v0 }
  0x42   : > { %v578_v20 = vld.sshfl [vmem:[#allocation1 + $0x8] sm:$0xff pattern:$0x75316420]  ;;  %v577_v21 = vld.sshfl [vmem:[#allocation1] sm:$0xff pattern:$0x75316420] }
  0x43   : > { %587 = vrot.lane.b32.xlu1 %v580_v18, %s1391_s7  ;;  %585 = vrot.lane.b32.xlu0 %v579_v19, %s1391_s7  ;;  %671 = vst [vmem:[#allocation1] ss:$2 sm:$0xff] %v1479_v1  ;;  %v1396_v18 = vmov 0  }
  0x44   : > { %488 = vrot.lane.b32.xlu2 %v482_v14, %s1390_s6  ;;  %1307 = vset.pattern.permute.xlu0 %v1396_v18 }
  0x45   : > { %1306 = vset.pattern.permute.xlu2 %v1396_v18 }
  0x48   : > { %v676_v22 = vld.sshfl [vmem:[#allocation1 + $0x10] sm:$0xff pattern:$0x75316420]  ;;  %v677_v23 = vld.sshfl [vmem:[#allocation1 + $0x18] sm:$0xff pattern:$0x75316420] }
  0x49   : > { %770 = vst [vmem:[#allocation1 + $0x10] ss:$2 sm:$0xff] %v1477_v0 }
  0x4a   : > { %v674_v24 = vld.sshfl [vmem:[#allocation1] sm:$0xff pattern:$0x75316420]  ;;  %v675_v25 = vld.sshfl [vmem:[#allocation1 + $0x8] sm:$0xff pattern:$0x75316420] }
  0x4b   : > { %581 = vrot.lane.b32.xlu0 %v577_v21, %s1391_s7  ;;  %678 = vrot.lane.b32.xlu1 %v674_v24, %s1392_s8  ;;  %768 = vst [vmem:[#allocation1] ss:$2 sm:$0xff] %v1479_v1  ;;  %v1215_v21 = vld [vmem:[%s1636_s1 + $0x18] sm:$0xf] }
  0x4c   : > { %490 = vrot.lane.b32.xlu2 %v483_v15, %s1390_s6  ;;  %s1070_s6 = scalar_lea.sflag [#allocation3], %s185_s23 }
  0x50   : > { %v773_v26 = vld.sshfl [vmem:[#allocation1 + $0x10] sm:$0xff pattern:$0x75316420]  ;;  %v774_v27 = vld.sshfl [vmem:[#allocation1 + $0x18] sm:$0xff pattern:$0x75316420] }
  0x51   : > { %867 = vst [vmem:[#allocation1 + $0x10] ss:$2 sm:$0xff] %v1477_v0 }
  0x52   : > { %v772_v28 = vld.sshfl [vmem:[#allocation1 + $0x8] sm:$0xff pattern:$0x75316420]  ;;  %v771_v29 = vld.sshfl [vmem:[#allocation1] sm:$0xff pattern:$0x75316420] }
  0x53   : > { %684 = vrot.lane.b32.xlu0 %v677_v23, %s1392_s8  ;;  %777 = vrot.lane.b32.xlu1 %v772_v28, %s1393_s9  ;;  %865 = vst [vmem:[#allocation1] ss:$2 sm:$0xff] %v1479_v1  ;;  %v1222_v28 = vld [vmem:[%s1636_s1 + $0x1c] sm:$0xf] }
  0x54   : > { %583 = vrot.lane.b32.xlu2 %v578_v20, %s1391_s7  ;;  %s1322_s7 = sshra.s32 %s1088_s5, 4  ;;  %s1323_s7 = int_to_ptr.hbm [resolvable:$true] %s1322_s7 }
  0x55   : > { %p1329_p1 = scmp.lt.s32.totalorder %s1323_s7, %s1638_s3 }
  0x58   : > { %v870_v30 = vld.sshfl [vmem:[#allocation1 + $0x10] sm:$0xff pattern:$0x75316420]  ;;  %v871_v31 = vld.sshfl [vmem:[#allocation1 + $0x18] sm:$0xff pattern:$0x75316420] }
  0x59   : > { %964 = vst [vmem:[#allocation1 + $0x10] ss:$2 sm:$0xff] %v1477_v0 }
  0x5a   : > { %v868_v32 = vld.sshfl [vmem:[#allocation1] sm:$0xff pattern:$0x75316420]  ;;  %v869_v33 = vld.sshfl [vmem:[#allocation1 + $0x8] sm:$0xff pattern:$0x75316420] }
  0x5b   : > { %779 = vrot.lane.b32.xlu1 %v773_v26, %s1393_s9  ;;  %775 = vrot.lane.b32.xlu0 %v771_v29, %s1393_s9  ;;  %962 = vst [vmem:[#allocation1] ss:$2 sm:$0xff] %v1479_v1 }
  0x5c   : > { %680 = vrot.lane.b32.xlu2 %v675_v25, %s1392_s8 }
  0x60   : > { %v967_v34 = vld.sshfl [vmem:[#allocation1 + $0x10] sm:$0xff pattern:$0x75316420]  ;;  %v968_v37 = vld.sshfl [vmem:[#allocation1 + $0x18] sm:$0xff pattern:$0x75316420] }
  0x62   : > { %v966_v35 = vld.sshfl [vmem:[#allocation1 + $0x8] sm:$0xff pattern:$0x75316420]  ;;  %v965_v36 = vld.sshfl [vmem:[#allocation1] sm:$0xff pattern:$0x75316420] }
  0x63   : > { %876 = vrot.lane.b32.xlu0 %v870_v30, %s1394_s10  ;;  %872 = vrot.lane.b32.xlu1 %v868_v32, %s1394_s10 }
  0x64   : > { %682 = vrot.lane.b32.xlu2 %v676_v22, %s1392_s8  ;;  %s1324_s8 = scalar_lea.hbm %s1323_s7, 12 }
  0x65   : > { %p1325_p12 = scmp.ne.s32.totalorder %s1323_s7, %s1324_s8 }
  0x67   : > { %p1326_p13 = pnand %p1325_p12, %p1457_p4 }
  0x69   : > { %p1327_p0 = pneg %p1326_p13 }
  0x6b   : > { %878 = vrot.lane.b32.xlu0 %v871_v31, %s1394_s10  ;;  %973 = vrot.lane.b32.xlu1 %v967_v34, %s1395_s11  ;;  %v1229_v34 = vld [vmem:[%s1636_s1 + $0x20] sm:$0xf] }
  0x6c   : > { %781 = vrot.lane.b32.xlu2 %v774_v27, %s1393_s9 }
  0x73   : > { %971 = vrot.lane.b32.xlu0 %v966_v35, %s1395_s11  ;;  %969 = vrot.lane.b32.xlu1 %v965_v36, %s1395_s11 }
  0x74   : > { %874 = vrot.lane.b32.xlu2 %v869_v33, %s1394_s10 }
  0x7c   : > { %975 = vrot.lane.b32.xlu2 %v968_v37, %s1395_s11  ;;  %s1328_s11 = scalar_lea.hbm %s1638_s3, 24 }
  0x7d   : > { %p1330_p2 = scmp.lt.s32.totalorder %s1328_s11, %s1324_s8 }
  0x7f   : > { %p1331_p3 = por %p1330_p2, %p1329_p1 }
  0x81   : > { %p1332_p5 = pnand %p1331_p3, %p1327_p0 }
  0x84   : > { %1056 = vperm.xlu2 %1306, %v1053_v16  }
  0x8d   : > { %v388_v39 = vpop.permute.xlu2 %387 }
  0x93   : > { %v219_v40 = vpop.permute.xlu0 %218 }
  0x94   : > { %v217_v41 = vpop.permute.xlu1 %216 }
  0x95   : > { %v224_v42 = vsel %vm222_vm2, %v217_v41, %v219_v40 }
  0x96   : > { %1177 = vmatpush.msk.msra.mxu1 %vm230_vm0, %v224_v42  ;;  %v390_v43 = vpop.permute.xlu2 %389 }
  0x97   : > { %1178 = vmatmul.msk.f32.vlgmr.msra.gmra.mxu1 %vm226_vm1, %v1174_v44  ;;  %v396_v49 = vsel %vm395_vm3, %v388_v39, %v390_v43 }
  0x98   : > { %1185 = vmatpush.msk.msrb.mxu1 %vm230_vm0, %v1484_v7 }
  0x9b   : > { %v221_v45 = vpop.permute.xlu0 %220 }
  0x9c   : > { %v215_v46 = vpop.permute.xlu1 %214  ;;  %v225_v47 = vsel %vm222_vm2, %v219_v40, %v221_v45 }
  0x9d   : > { %v223_v48 = vsel %vm222_vm2, %v215_v46, %v217_v41  ;;  %1179 = vmatpush.msk.msra.mxu2 %vm230_vm0, %v225_v47 }
  0x9e   : > { %1175 = vmatpush.msk.msra.mxu0 %vm230_vm0, %v223_v48  ;;  %v489_v50 = vpop.permute.xlu2 %488  ;;  %1180 = vmatmul.msk.f32.vlgmr.msra.gmra.mxu2 %vm226_vm1, %v1174_v44 }
  0x9f   : > { %1188 = vmatpush.msk.msrb.mxu2 %vm230_vm0, %v396_v49  ;;  %1176 = vmatmul.msk.f32.vlgmr.msra.gmra.mxu0 %vm226_vm1, %v1174_v44 }
  0xa0   : > { %1183 = vmatpush.msk.msrb.mxu0 %vm230_vm0, %v1489_v9  ;;  %1186 = vmatmul.msk.f32.vlgmr.msrb.gmra.mxu1 %vm226_vm1, %v200_v38 }
  0xa3   : > { %v392_v51 = vpop.permute.xlu0 %391 }
  0xa4   : > { %v394_v52 = vpop.permute.xlu1 %393  ;;  %v397_v53 = vsel %vm395_vm3, %v390_v43, %v392_v51 }
  0xa5   : > { %v398_v55 = vsel %vm395_vm3, %v392_v51, %v394_v52  ;;  %1190 = vmatpush.msk.msrb.mxu3 %vm230_vm0, %v397_v53 }
  0xa6   : > { %1192 = vmatpush.msk.msra.mxu0 %vm230_vm0, %v398_v55  ;;  %v491_v56 = vpop.permute.xlu2 %490  ;;  %1191 = vmatmul.msk.f32.vlgmr.msrb.gmra.mxu3 %vm226_vm1, %v1187_v54 }
  0xa7   : > { %v495_v57 = vsel %vm492_vm4, %v489_v50, %v491_v56  ;;  %1189 = vmatmul.msk.f32.vlgmr.msrb.gmra.mxu2 %vm226_vm1, %v1187_v54  ;;  %1184 = vmatmul.msk.f32.vlgmr.msrb.gmra.mxu0 %vm226_vm1, %v200_v38 }
  0xa8   : > { %1199 = vmatpush.msk.msra.mxu3 %vm230_vm0, %v495_v57 }
  0xad   : > { %v487_v58 = vpop.permute.xlu1 %486  ;;  %v485_v59 = vpop.permute.xlu0 %484 }
  0xae   : > { %v494_v61 = vsel %vm492_vm4, %v487_v58, %v489_v50  ;;  %v493_v62 = vsel %vm492_vm4, %v485_v59, %v487_v58  ;;  %v584_v63 = vpop.permute.xlu2 %583  ;;  %1200 = vmatmul.msk.f32.vlgmr.msra.gmra.mxu3 %vm226_vm1, %v1194_v60 }
  0xaf   : > { %1195 = vmatpush.msk.msra.mxu1 %vm230_vm0, %v493_v62  ;;  %1197 = vmatpush.msk.msra.mxu2 %vm230_vm0, %v494_v61  ;;  %v331_v44 = vpop.f32.mrf.mxu3 }
  0xb0   : > { %1193 = vmatmul.msk.f32.vlgmr.msra.gmra.mxu0 %vm226_vm1, %v1187_v54  ;;  %1196 = vmatmul.msk.f32.vlgmr.msra.gmra.mxu1 %vm226_vm1, %v1194_v60 }
  0xb1   : > { %1198 = vmatmul.msk.f32.vlgmr.msra.gmra.mxu2 %vm226_vm1, %v1194_v60 }
  0xb5   : > { %v588_v0 = vpop.permute.xlu1 %587  ;;  %v586_v1 = vpop.permute.xlu0 %585 }
  0xb6   : > { %v591_v2 = vsel %vm589_vm5, %v584_v63, %v586_v1  ;;  %v592_v3 = vsel %vm589_vm5, %v586_v1, %v588_v0  ;;  %v681_v4 = vpop.permute.xlu2 %680 }
  0xb7   : > { %1204 = vmatpush.msk.msrb.mxu1 %vm230_vm0, %v591_v2  ;;  %1206 = vmatpush.msk.msrb.mxu2 %vm230_vm0, %v592_v3 }
  0xb8   : > { %1205 = vmatmul.msk.f32.vlgmr.msrb.gmra.mxu1 %vm226_vm1, %v1201_v5 }
  0xb9   : > { %1207 = vmatmul.msk.f32.vlgmr.msrb.gmra.mxu2 %vm226_vm1, %v1201_v5 }
  0xbd   : > { %v582_v6 = vpop.permute.xlu0 %581  ;;  %v679_v7 = vpop.permute.xlu1 %678 }
  0xbe   : > { %v590_v9 = vsel %vm589_vm5, %v582_v6, %v584_v63  ;;  %v687_v10 = vsel %vm686_vm6, %v679_v7, %v681_v4  ;;  %v683_v11 = vpop.permute.xlu2 %682 }
  0xbf   : > { %1202 = vmatpush.msk.msrb.mxu0 %vm230_vm0, %v590_v9  ;;  %1209 = vmatpush.msk.msrb.mxu3 %vm230_vm0, %v687_v10  ;;  %v688_v12 = vsel %vm686_vm6, %v681_v4, %v683_v11 }
  0xc0   : > { %1203 = vmatmul.msk.f32.vlgmr.msrb.gmra.mxu0 %vm226_vm1, %v1201_v5  ;;  %1210 = vmatmul.msk.f32.vlgmr.msrb.gmra.mxu3 %vm226_vm1, %v1208_v8 }
  0xc1   : > { %1211 = vmatpush.msk.msra.mxu0 %vm230_vm0, %v688_v12 }
  0xc5   : > { %v685_v13 = vpop.permute.xlu0 %684  ;;  %v778_v14 = vpop.permute.xlu1 %777 }
  0xc6   : > { %v689_v15 = vsel %vm686_vm6, %v683_v11, %v685_v13  ;;  %v782_v17 = vpop.permute.xlu2 %781 }
  0xc7   : > { %1213 = vmatpush.msk.msra.mxu1 %vm230_vm0, %v689_v15 }
  0xc8   : > { %1212 = vmatmul.msk.f32.vlgmr.msra.gmra.mxu0 %vm226_vm1, %v1208_v8  ;;  %1214 = vmatmul.msk.f32.vlgmr.msra.gmra.mxu1 %vm226_vm1, %v1208_v8 }
  0xcd   : > { %v780_v19 = vpop.permute.xlu1 %779  ;;  %v776_v20 = vpop.permute.xlu0 %775 }
  0xce   : > { %v785_v22 = vsel %vm783_vm7, %v778_v14, %v780_v19  ;;  %v786_v23 = vsel %vm783_vm7, %v780_v19, %v782_v17  ;;  %v784_v24 = vsel %vm783_vm7, %v776_v20, %v778_v14  ;;  %v875_v25 = vpop.permute.xlu2 %874 }
  0xcf   : > { %1216 = vmatpush.msk.msra.mxu2 %vm230_vm0, %v784_v24  ;;  %1218 = vmatpush.msk.msra.mxu3 %vm230_vm0, %v785_v22 }
  0xd0   : > { %1220 = vmatpush.msk.msrb.mxu0 %vm230_vm0, %v786_v23  ;;  %1217 = vmatmul.msk.f32.vlgmr.msra.gmra.mxu2 %vm226_vm1, %v1215_v21 }
  0xd1   : > { %1219 = vmatmul.msk.f32.vlgmr.msra.gmra.mxu3 %vm226_vm1, %v1215_v21  ;;  %1221 = vmatmul.msk.f32.vlgmr.msrb.gmra.mxu0 %vm226_vm1, %v1215_v21 }
  0xd5   : > { %v877_v26 = vpop.permute.xlu0 %876  ;;  %v873_v27 = vpop.permute.xlu1 %872 }
  0xd6   : > { %v882_v29 = vsel %vm880_vm8, %v875_v25, %v877_v26  ;;  %v881_v30 = vsel %vm880_vm8, %v873_v27, %v875_v25  ;;  %v976_v31 = vpop.permute.xlu2 %975 }
  0xd7   : > { %1223 = vmatpush.msk.msrb.mxu1 %vm230_vm0, %v881_v30  ;;  %1225 = vmatpush.msk.msrb.mxu2 %vm230_vm0, %v882_v29 }
  0xd8   : > { %1224 = vmatmul.msk.f32.vlgmr.msrb.gmra.mxu1 %vm226_vm1, %v1222_v28  ;;  %1226 = vmatmul.msk.f32.vlgmr.msrb.gmra.mxu2 %vm226_vm1, %v1222_v28 }
  0xdd   : > { %v879_v32 = vpop.permute.xlu0 %878  ;;  %v974_v33 = vpop.permute.xlu1 %973 }
  0xde   : > { %v883_v35 = vsel %vm880_vm8, %v877_v26, %v879_v32  ;;  %v980_v36 = vsel %vm977_vm9, %v974_v33, %v976_v31  ;;  %v1057_v23 = vpop.permute.xlu2 %1056 }
  0xdf   : > { %1227 = vmatpush.msk.msrb.mxu3 %vm230_vm0, %v883_v35  ;;  %1234 = vmatpush.msk.msra.mxu2 %vm230_vm0, %v980_v36 }
  0xe0   : > { %1228 = vmatmul.msk.f32.vlgmr.msrb.gmra.mxu3 %vm226_vm1, %v1222_v28  ;;  %1235 = vmatmul.msk.f32.vlgmr.msra.gmra.mxu2 %vm226_vm1, %v1229_v34 }
  0xe5   : > { %v972_v37 = vpop.permute.xlu0 %971  ;;  %v970_v38 = vpop.permute.xlu1 %969 }
  0xe6   : > { %v979_v39 = vsel %vm977_vm9, %v972_v37, %v974_v33  ;;  %v978_v40 = vsel %vm977_vm9, %v970_v38, %v972_v37 }
  0xe7   : > { %1230 = vmatpush.msk.msra.mxu0 %vm230_vm0, %v978_v40  ;;  %1232 = vmatpush.msk.msra.mxu1 %vm230_vm0, %v979_v39 }
  0xe8   : > { %1231 = vmatmul.msk.f32.vlgmr.msra.gmra.mxu0 %vm226_vm1, %v1229_v34  ;;  %1233 = vmatmul.msk.f32.vlgmr.msra.gmra.mxu1 %vm226_vm1, %v1229_v34 }
 0x114   : > { %v274_v43 = vpop.f32.mrf.mxu1 }
 0x11c   : > { %v254_v41 = vpop.f32.mrf.mxu0 }
 0x11d   : > { %v371_v47 = vpop.f32.mrf.mxu1  ;;  %v332_v56 = vadd.f32 %v331_v44, %v254_v41 }
 0x121   : > { %v294_v42 = vpop.f32.mrf.mxu2 }
 0x122   : > { %v372_v58 = vadd.f32 %v371_v47, %v294_v42 }
 0x124   : > { %v351_v45 = vpop.f32.mrf.mxu0 }
 0x125   : > { %v352_v57 = vadd.f32 %v351_v45, %v274_v43 }
 0x129   : > { %v445_v48 = vpop.f32.mrf.mxu3 }
 0x12a   : > { %v425_v46 = vpop.f32.mrf.mxu2  ;;  %v469_v1 = vadd.f32 %v445_v48, %v352_v57 }
 0x12b   : > { %v468_v62 = vadd.f32 %v425_v46, %v332_v56 }
 0x12d   : > { %v465_v49 = vpop.f32.mrf.mxu0  ;;  %v522_v51 = vpop.f32.mrf.mxu1 }
 0x12e   : > { %v470_v0 = vadd.f32 %v465_v49, %v372_v58  ;;  %v565_v2 = vadd.f32 %v522_v51, %v468_v62 }
 0x131   : > { %v562_v52 = vpop.f32.mrf.mxu3 }
 0x132   : > { %v567_v4 = vadd.f32 %v562_v52, %v470_v0 }
 0x134   : > { %v542_v50 = vpop.f32.mrf.mxu2 }
 0x135   : > { %v639_v55 = vpop.f32.mrf.mxu1  ;;  %v566_v3 = vadd.f32 %v542_v50, %v469_v1 }
 0x137   : > { %v663_v10 = vadd.f32 %v639_v55, %v566_v3 }
 0x13c   : > { %v659_v54 = vpop.f32.mrf.mxu2 }
 0x13d   : > { %v619_v53 = vpop.f32.mrf.mxu0  ;;  %v664_v11 = vadd.f32 %v659_v54, %v567_v4 }
 0x13e   : > { %v662_v7 = vadd.f32 %v619_v53, %v565_v2 }
 0x143   : > { %v716_v59 = vpop.f32.mrf.mxu3 }
 0x144   : > { %v759_v12 = vadd.f32 %v716_v59, %v662_v7 }
 0x145   : > { %v736_v60 = vpop.f32.mrf.mxu0  ;;  %v756_v63 = vpop.f32.mrf.mxu1 }
 0x146   : > { %v760_v13 = vadd.f32 %v736_v60, %v663_v10  ;;  %v761_v14 = vadd.f32 %v756_v63, %v664_v11 }
 0x14e   : > { %v853_v8 = vpop.f32.mrf.mxu0 }
 0x14f   : > { %v858_v16 = vadd.f32 %v853_v8, %v761_v14 }
 0x153   : > { %v813_v61 = vpop.f32.mrf.mxu2 }
 0x154   : > { %v833_v5 = vpop.f32.mrf.mxu3  ;;  %v856_v15 = vadd.f32 %v813_v61, %v759_v12 }
 0x155   : > { %v910_v9 = vpop.f32.mrf.mxu1  ;;  %v857_v17 = vadd.f32 %v833_v5, %v760_v13 }
 0x156   : > { %v953_v20 = vadd.f32 %v910_v9, %v856_v15 }
 0x15b   : > { %v930_v6 = vpop.f32.mrf.mxu2 }
 0x15c   : > { %v954_v21 = vadd.f32 %v930_v6, %v857_v17 }
 0x163   : > { %v950_v18 = vpop.f32.mrf.mxu3  ;;  %v1047_v19 = vpop.f32.mrf.mxu2 }
 0x164   : > { %v955_v22 = vadd.f32 %v950_v18, %v858_v16 }
 0x165   : > { %v1007_v24 = vpop.f32.mrf.mxu0  ;;  %v1027_v25 = vpop.f32.mrf.mxu1 }
 0x166   : > { %v1050_v26 = vadd.f32 %v1007_v24, %v953_v20  ;;  %v1051_v27 = vadd.f32 %v1027_v25, %v954_v21  ;;  %v1052_v28 = vadd.f32 %v1047_v19, %v955_v22 }
 0x168   : > { %v1060_v29 = vadd.f32 %v1057_v23, %v1051_v27  ;;  %v1061_v30 = vadd.f32 %v1057_v23, %v1052_v28  ;;  %v1059_v31 = vadd.f32 %v1057_v23, %v1050_v26 }
 0x16a   : > { %v1064_v32 = vrot.slane %v1060_v29, 4  ;;  %1068 = vst [vmem:[%s187_s15 + $0x8] sm:$0xf] %v1061_v30 }
 0x16c   : > { %v1065_v33 = vsel %vm230_vm0, %v1059_v31, %v1064_v32 }
 0x16d   : > { %1067 = vst [vmem:[%s187_s15] sm:$0xff] %v1065_v33 }
 0x16e   : > { %1335 = shalt.err (!%p1332_p5)
}
 0x16f   : > { %1242 = dma.vmem_to_hbm [thread:$0]  (%p1457_p4), %s1086_s4, 192, %s1088_s5, %s1070_s6  }
 0x170 PF: > { %p1248_p6 = scmp.ge.s32.totalorder %s1386_s17, 2  ;;  %s1099_s21 = sand.u32 1, %s1366_s12  }
 0x171   : > { %s1100_s23 = scalar_lea.sflag [#allocation3], %s1099_s21 }
 0x172   : > { %p1245_p7 = pnand %p1248_p6, %p1464_p8 }
 0x174   : > { %p1246_p9 = pneg %p1245_p7 }
 0x176   : > { %1361 = dma.done.wait (%p1246_p9), %s1100_s23, 192  }
 0x177   : > { %1363 = vsyncadd (%p1246_p9), %s1100_s23, 4294967104  ;;  %s16_s17 = sadd.s32 1, %s1386_s17   ;;  %s1641_s12 = smov %s1370_s13 }
 0x178   : > { %p13_p10 = scmp.ge.s32.totalorder %s16_s17, 4   ;;  %s1642_s13 = smov %s1374_s14 }
 0x179   : > { %s1643_s14 = smov %s1470_s25  ;;  %s1644_s15 = smov %s1382_s16 }
 0x17a   : > { %s1645_s16 = smov %s1647_s20  ;;  %15 = sbr.rel (!%p13_p10) target bundleno = 4 (0x4), region = 84 }
 0x17f   :  { %1106 = vsyncpa [#allocation3], 1 }
 0x180   :  { %1108 = vsyncpa [#allocation3 + $0x1], 1 }

</bundles_post_ra>
